<compile_context>
chip_gen: v5e
topology: v5e:2x2
jax: 0.10.0
libtpu: 0.0.40
codegen_flags: <defaults>
</compile_context>

<pallas_src>
import functools
import math

import jax
import jax.numpy as jnp
from jax import lax
from jax.experimental import pallas as pl
from jax.experimental.pallas import tpu as pltpu


def _vmem_limit_bytes():
    """Generation-aware scoped-VMEM limit: ~75% of physical per-core VMEM."""
    cap = 128 * 1024 * 1024
    try:
        cap = getattr(pltpu.get_tpu_info(), "vmem_capacity_bytes", cap)
    except Exception:
        pass
    return int(cap) * 3 // 4      # ~96 MiB on v5e/v6e, ~48 MiB on v7x


def _pick_kv_tile(T):
    """KV tile size: full T for short sequences, else a divisor <= 512 (mult of 8)."""
    if T <= 1024:
        return T
    for tk in (512, 256, 128, 64, 32, 16, 8):
        if T % tk == 0:
            return tk
    return T


def _fused_attn_kernel(*refs, scale, return_att):
    """One (batch, head, kv_tile) grid step.

    Inputs : xq (1,T,C) bf16, xkv (1,tk,C) bf16, Wq (1,C,D) bf16, bq (1,1,D) f32,
             Wkv (1,C,2D) bf16, bkv (1,1,2D) f32, Wp (1,D,C) bf16, bp (1,C) f32
    Outputs: y (1,T,C) f32   [+ att (1,1,T,T) bf16 when return_att]
    Scratch: q (T,D) bf16, m (T,1) f32, l (T,1) f32, p@v acc (T,D) f32,
             output-projection acc (T,C) f32
    """
    if return_att:
        (xq_ref, xkv_ref, wq_ref, bq_ref, wkv_ref, bkv_ref, wp_ref, bp_ref,
         y_ref, att_ref, q_sc, m_sc, l_sc, pv_sc, y_sc) = refs
    else:
        (xq_ref, xkv_ref, wq_ref, bq_ref, wkv_ref, bkv_ref, wp_ref, bp_ref,
         y_ref, q_sc, m_sc, l_sc, pv_sc, y_sc) = refs
        att_ref = None

    h = pl.program_id(1)
    kv = pl.program_id(2)
    last_h = pl.num_programs(1) - 1
    last_kv = pl.num_programs(2) - 1
    D = q_sc.shape[1]

    # Zero the fused output-projection accumulator once per batch element.
    @pl.when(jnp.logical_and(h == 0, kv == 0))
    def _():
        y_sc[...] = jnp.zeros_like(y_sc)

    # Per-head init: q projection (reused by every KV tile) + online-softmax state.
    @pl.when(kv == 0)
    def _():
        q = jnp.dot(xq_ref[0], wq_ref[0],
                    preferred_element_type=jnp.float32) + bq_ref[0]   # (T, D) f32
        q_sc[...] = (q * scale).astype(q_sc.dtype)   # fold 1/sqrt(D) into q
        m_sc[...] = jnp.full_like(m_sc, -jnp.inf)
        l_sc[...] = jnp.zeros_like(l_sc)
        pv_sc[...] = jnp.zeros_like(pv_sc)

    # K/V tile projection: one wide matmul (N = 2D) against the concatenated weights.
    kvp = jnp.dot(xkv_ref[0], wkv_ref[0],
                  preferred_element_type=jnp.float32) + bkv_ref[0]    # (tk, 2D) f32
    k = kvp[:, :D].astype(jnp.bfloat16)
    v = kvp[:, D:].astype(jnp.bfloat16)

    # Scores: contract last dims (no k-transpose copy). bf16 MXU, f32 accumulation.
    s = lax.dot_general(q_sc[...], k, (((1,), (1,)), ((), ())),
                        preferred_element_type=jnp.float32)           # (T, tk) f32

    T, tk = s.shape
    row = lax.broadcasted_iota(jnp.int32, (T, tk), 0)
    col = lax.broadcasted_iota(jnp.int32, (T, tk), 1) + kv * tk
    s = jnp.where(row >= col, s, -1e30)   # causal mask generated in-kernel

    # Online softmax update (all f32).  Diagonal of KV tile 0 is never masked,
    # so m stays finite and fully-masked later tiles contribute exactly zero.
    m_prev = m_sc[...]
    m_new = jnp.maximum(m_prev, jnp.max(s, axis=-1, keepdims=True))
    alpha = jnp.exp(m_prev - m_new)
    p = jnp.exp(s - m_new)                                            # (T, tk) f32
    l_sc[...] = alpha * l_sc[...] + jnp.sum(p, axis=-1, keepdims=True)
    pv_sc[...] = alpha * pv_sc[...] + jnp.dot(p.astype(jnp.bfloat16), v,
                                              preferred_element_type=jnp.float32)
    m_sc[...] = m_new

    # TODO(synk): attn_drop / resid_drop are identity here (eval-mode dropout).

    # Per-head finalize: normalize and fold straight into the output projection.
    @pl.when(kv == last_kv)
    def _():
        if return_att:
            inv_l = 1.0 / l_sc[...]                      # exact on the att path
            # return_att forces a single KV tile, so p is the full (T, T) numerator.
            att_ref[0, 0] = (p * inv_l).astype(att_ref.dtype)
        else:
            inv_l = pl.reciprocal(l_sc[...], approx=True)   # EUP slot
        y_h = (pv_sc[...] * inv_l).astype(jnp.bfloat16)     # (T, D)
        y_sc[...] += jnp.dot(y_h, wp_ref[0],
                             preferred_element_type=jnp.float32)

    # Batch-element finalize: add bias, single lane-dense (T, C) f32 store.
    @pl.when(jnp.logical_and(h == last_h, kv == last_kv))
    def _():
        y_ref[0] = (y_sc[...] + bp_ref[...]).astype(y_ref.dtype)


def causal_attention(x, params, n_heads, *, return_att=False, kv_tile=None):
    """x: (B, T, C) f32.  Returns (y, att) like the PyTorch module's forward
    (eval mode); att is None on the default perf path (return_att=False).

    TODO(synk): layer_past (KV-cache) path is not implemented; only layer_past=None.
    """
    B, T, C = x.shape
    H = n_heads
    D = C // H
    scale = 1.0 / math.sqrt(D)

    if return_att:
        tk = T    # exact normalized att requires the full row per (b, h) step
    else:
        tk = _pick_kv_tile(T) if kv_tile is None else kv_tile
    assert T % tk == 0
    n_kv = T // tk

    x_bf = x.astype(jnp.bfloat16)   # cast once in the wrapper, not per grid step

    # Head-split the transposed weights (cheap XLA-side layout plumbing):
    #   Wt   (C, C) -> (H, C, D): per-head output slice of the QKV projections
    #   Wp^T (C, C) -> (H, D, C): per-head input slice of the output projection
    def split_out(w_t):
        return jnp.transpose(w_t.reshape(C, H, D), (1, 0, 2))

    wq_h = split_out(params["wq_t"])
    wkv_h = jnp.concatenate([split_out(params["wk_t"]),
                             split_out(params["wv_t"])], axis=-1)     # (H, C, 2D)
    bq_h = params["bq"].reshape(H, 1, D)
    bkv_h = jnp.concatenate([params["bk"].reshape(H, 1, D),
                             params["bv"].reshape(H, 1, D)], axis=-1)  # (H, 1, 2D)
    wp_h = params["wp_t"].reshape(H, D, C)                             # (H, D, C)
    bp = params["bp"].astype(jnp.float32)                              # (1, C)

    in_specs = [
        pl.BlockSpec((1, T, C), lambda b, h, kv: (b, 0, 0)),       # x for q (fixed over h, kv)
        pl.BlockSpec((1, tk, C), lambda b, h, kv: (b, kv, 0)),     # x rows for this KV tile
        pl.BlockSpec((1, C, D), lambda b, h, kv: (h, 0, 0)),       # Wq
        pl.BlockSpec((1, 1, D), lambda b, h, kv: (h, 0, 0)),       # bq
        pl.BlockSpec((1, C, 2 * D), lambda b, h, kv: (h, 0, 0)),   # [Wk | Wv]
        pl.BlockSpec((1, 1, 2 * D), lambda b, h, kv: (h, 0, 0)),   # [bk | bv]
        pl.BlockSpec((1, D, C), lambda b, h, kv: (h, 0, 0)),       # Wp (per-head slice)
        pl.BlockSpec((1, C), lambda b, h, kv: (0, 0)),             # bp
    ]

    y_shape = jax.ShapeDtypeStruct((B, T, C), jnp.float32)
    y_spec = pl.BlockSpec((1, T, C), lambda b, h, kv: (b, 0, 0))   # resident over h, kv
    if return_att:
        out_shape = (y_shape, jax.ShapeDtypeStruct((B, H, T, T), jnp.bfloat16))
        out_specs = (y_spec,
                     pl.BlockSpec((1, 1, T, T), lambda b, h, kv: (b, h, 0, 0)))
    else:
        out_shape = y_shape
        out_specs = y_spec

    scratch_shapes = [
        pltpu.VMEM((T, D), jnp.bfloat16),   # q (per head)
        pltpu.VMEM((T, 1), jnp.float32),    # running max m
        pltpu.VMEM((T, 1), jnp.float32),    # running sum l
        pltpu.VMEM((T, D), jnp.float32),    # running p @ v
        pltpu.VMEM((T, C), jnp.float32),    # fused output-projection accumulator
    ]

    kernel = functools.partial(_fused_attn_kernel, scale=scale,
                               return_att=return_att)
    outs = pl.pallas_call(
        kernel,
        out_shape=out_shape,
        grid_spec=pltpu.PrefetchScalarGridSpec(
            num_scalar_prefetch=0,
            grid=(B, H, n_kv),
            in_specs=in_specs,
            out_specs=out_specs,
            scratch_shapes=scratch_shapes),
        compiler_params=pltpu.CompilerParams(
            dimension_semantics=("parallel", "arbitrary", "arbitrary"),
            vmem_limit_bytes=_vmem_limit_bytes()),
    )(x_bf, x_bf, wq_h, bq_h, wkv_h, bkv_h, wp_h, bp)

    if return_att:
        y, att = outs
        return y, att
    return outs, None


def init_params(key, hidden_dim):
    """Deterministic synthetic parameters matching the PyTorch module's shapes.
    Weights are stored transposed (in, out) and in bf16 (MXU-native); biases f32."""
    ks = jax.random.split(key, 8)
    bound = 1.0 / math.sqrt(hidden_dim)

    def lin(kw, kb):
        w = jax.random.uniform(kw, (hidden_dim, hidden_dim), jnp.float32, -bound, bound)
        b = jax.random.uniform(kb, (1, hidden_dim), jnp.float32, -bound, bound)
        return w.T.astype(jnp.bfloat16), b

    wk_t, bk = lin(ks[0], ks[1])
    wq_t, bq = lin(ks[2], ks[3])
    wv_t, bv = lin(ks[4], ks[5])
    wp_t, bp = lin(ks[6], ks[7])
    return dict(wk_t=wk_t, bk=bk, wq_t=wq_t, bq=bq,
                wv_t=wv_t, bv=bv, wp_t=wp_t, bp=bp)


def _ref_forward(x, params, n_heads):
    """Pure-JAX reference (same bf16 weights, f32 math) mirroring the PyTorch module."""
    B, T, C = x.shape
    H = n_heads
    D = C // H

    def lin(xx, w_t, b):
        return xx @ w_t.astype(jnp.float32) + b

    k = lin(x, params["wk_t"], params["bk"]).reshape(B, T, H, D).transpose(0, 2, 1, 3)
    q = lin(x, params["wq_t"], params["bq"]).reshape(B, T, H, D).transpose(0, 2, 1, 3)
    v = lin(x, params["wv_t"], params["bv"]).reshape(B, T, H, D).transpose(0, 2, 1, 3)
    att = (q @ jnp.swapaxes(k, -1, -2)) * (1.0 / math.sqrt(D))
    mask = jnp.tril(jnp.ones((T, T), jnp.float32))
    att = jnp.where(mask == 0, -jnp.inf, att)
    att = jax.nn.softmax(att, axis=-1)
    y = att @ v
    y = y.transpose(0, 2, 1, 3).reshape(B, T, C)
    y = y @ params["wp_t"].astype(jnp.float32) + params["bp"]
    return y, att


if __name__ == "__main__":
    B, T, C, H = 2, 8, 32, 4

    key = jax.random.PRNGKey(0)
    k_x, k_p = jax.random.split(key)
    x = jax.random.normal(k_x, (B, T, C), jnp.float32)
    params = init_params(k_p, C)

    # Module semantics: returns (y, att)
    y, att = causal_attention(x, params, n_heads=H, return_att=True)
    # Perf path (default): skip the O(B*H*T^2) attention writeback entirely
    y2, att2 = causal_attention(x, params, n_heads=H)
    jax.block_until_ready((y, att, y2))

    assert y.shape == (B, T, C) and att.shape == (B, H, T, T)
    assert y2.shape == (B, T, C) and att2 is None
    assert bool(jnp.all(jnp.isfinite(y))) and bool(jnp.all(jnp.isfinite(att.astype(jnp.float32))))
    # causal structure: strictly-upper-triangular attention weights are exactly 0
    upper = 1.0 - jnp.tril(jnp.ones((T, T), jnp.float32))
    assert bool(jnp.all(att.astype(jnp.float32) * upper == 0.0))
    # both paths agree (approx vs exact reciprocal)
    assert bool(jnp.allclose(y, y2, atol=2e-2, rtol=2e-2))
    # numerics vs pure-JAX reference (bf16 activation rounding -> loose tolerance)
    y_ref, att_ref = _ref_forward(x, params, H)
    assert bool(jnp.allclose(y, y_ref, atol=1e-1, rtol=1e-1))
    assert bool(jnp.allclose(att.astype(jnp.float32), att_ref, atol=5e-2))
    print("KERNEL_OK")
</pallas_src>

<mosaic_0001>
module attributes {stable_mosaic.version = 11 : i64} {
  func.func @_fused_attn_kernel(%arg0: i32, %arg1: i32, %arg2: i32, %arg3: memref<1x8x32xbf16, #tpu.memory_space<vmem>>, %arg4: memref<1x8x32xbf16, #tpu.memory_space<vmem>>, %arg5: memref<1x32x8xbf16, #tpu.memory_space<vmem>>, %arg6: memref<1x1x8xf32, #tpu.memory_space<vmem>>, %arg7: memref<1x32x16xbf16, #tpu.memory_space<vmem>>, %arg8: memref<1x1x16xf32, #tpu.memory_space<vmem>>, %arg9: memref<1x8x32xbf16, #tpu.memory_space<vmem>>, %arg10: memref<1x32xf32, #tpu.memory_space<vmem>>, %arg11: memref<1x8x32xf32, #tpu.memory_space<vmem>>, %arg12: memref<1x1x8x8xbf16, #tpu.memory_space<vmem>>, %arg13: memref<8x8xbf16, #tpu.memory_space<vmem>>, %arg14: memref<8x1xf32, #tpu.memory_space<vmem>>, %arg15: memref<8x1xf32, #tpu.memory_space<vmem>>, %arg16: memref<8x8xf32, #tpu.memory_space<vmem>>, %arg17: memref<8x32xf32, #tpu.memory_space<vmem>>) attributes {dimension_semantics = [#tpu.dimension_semantics<parallel>, #tpu.dimension_semantics<arbitrary>, #tpu.dimension_semantics<arbitrary>], iteration_bounds = array<i64: 2, 4, 1>, scalar_prefetch = 0 : i64, scratch_operands = 5 : i64, tpu.core_type = #tpu.core_type<tc>, window_params = [{transform_indices = @transform_0, window_bounds = array<i64: 1, 8, 32>}, {transform_indices = @transform_1, window_bounds = array<i64: 1, 8, 32>}, {transform_indices = @transform_2, window_bounds = array<i64: 1, 32, 8>}, {transform_indices = @transform_3, window_bounds = array<i64: 1, 1, 8>}, {transform_indices = @transform_4, window_bounds = array<i64: 1, 32, 16>}, {transform_indices = @transform_5, window_bounds = array<i64: 1, 1, 16>}, {transform_indices = @transform_6, window_bounds = array<i64: 1, 8, 32>}, {pipeline_mode = #tpu.pipeline_mode<synchronous>, transform_indices = @transform_7, window_bounds = array<i64: 1, 32>}, {transform_indices = @transform_8, window_bounds = array<i64: 1, 8, 32>}, {transform_indices = @transform_9, window_bounds = array<i64: 1, 1, 8, 8>}]} {
    %c0_i32 = arith.constant 0 : i32
    %0 = arith.cmpi eq, %arg1, %c0_i32 : i32
    %c0_i32_0 = arith.constant 0 : i32
    %1 = arith.cmpi eq, %arg2, %c0_i32_0 : i32
    %2 = arith.andi %0, %1 : i1
    %3 = arith.extui %2 : i1 to i32
    %c0_i32_1 = arith.constant 0 : i32
    %4 = arith.cmpi ne, %3, %c0_i32_1 : i32
    scf.if %4 {
      %cst_35 = arith.constant 0.000000e+00 : f32
      %62 = vector.broadcast %cst_35 : f32 to vector<8x32xf32>
      %c0_36 = arith.constant 0 : index
      %c0_37 = arith.constant 0 : index
      %63 = vector.load %arg17[%c0_36, %c0_37] : memref<8x32xf32, #tpu.memory_space<vmem>>, vector<8x32xf32>
      tpu.vector_store %arg17[%c0_36, %c0_37], %62 {strides = array<i32>} : memref<8x32xf32, #tpu.memory_space<vmem>>, vector<8x32xf32>,
    } else {
    }
    %c0_i32_2 = arith.constant 0 : i32
    %5 = arith.cmpi eq, %arg2, %c0_i32_2 : i32
    %6 = arith.extui %5 : i1 to i32
    %c0_i32_3 = arith.constant 0 : i32
    %7 = arith.cmpi ne, %6, %c0_i32_3 : i32
    scf.if %7 {
      %c0_35 = arith.constant 0 : index
      %c0_36 = arith.constant 0 : index
      %c0_37 = arith.constant 0 : index
      %62 = vector.load %arg3[%c0_35, %c0_36, %c0_37] : memref<1x8x32xbf16, #tpu.memory_space<vmem>>, vector<1x8x32xbf16>
      %63 = vector.shape_cast %62 : vector<1x8x32xbf16> to vector<8x32xbf16>
      %c0_38 = arith.constant 0 : index
      %c0_39 = arith.constant 0 : index
      %c0_40 = arith.constant 0 : index
      %64 = vector.load %arg5[%c0_38, %c0_39, %c0_40] : memref<1x32x8xbf16, #tpu.memory_space<vmem>>, vector<1x32x8xbf16>
      %65 = vector.shape_cast %64 : vector<1x32x8xbf16> to vector<32x8xbf16>
      %cst_41 = arith.constant dense<0.000000e+00> : vector<8x8xf32>
      %66 = tpu.matmul %63, %65, %cst_41 {dimension_numbers = #tpu.dot_dimension_numbers<[1], [0], [0], [1], [0, 0, 1, 1], [], []>} : vector<8x32xbf16>, vector<32x8xbf16>, vector<8x8xf32> -> vector<8x8xf32>
      %c0_42 = arith.constant 0 : index
      %c0_43 = arith.constant 0 : index
      %c0_44 = arith.constant 0 : index
      %67 = vector.load %arg6[%c0_42, %c0_43, %c0_44] : memref<1x1x8xf32, #tpu.memory_space<vmem>>, vector<1x1x8xf32>
      %68 = vector.shape_cast %67 : vector<1x1x8xf32> to vector<1x8xf32>
      %69 = vector.broadcast %68 : vector<1x8xf32> to vector<8x8xf32>
      %70 = arith.addf %66, %69 : vector<8x8xf32>
      %cst_45 = arith.constant 0.353553385 : f32
      %71 = vector.broadcast %cst_45 : f32 to vector<8x8xf32>
      %72 = arith.mulf %70, %71 : vector<8x8xf32>
      %73 = arith.truncf %72 : vector<8x8xf32> to vector<8x8xbf16>
      %c0_46 = arith.constant 0 : index
      %c0_47 = arith.constant 0 : index
      %74 = vector.load %arg13[%c0_46, %c0_47] : memref<8x8xbf16, #tpu.memory_space<vmem>>, vector<8x8xbf16>
      tpu.vector_store %arg13[%c0_46, %c0_47], %73 {strides = array<i32>} : memref<8x8xbf16, #tpu.memory_space<vmem>>, vector<8x8xbf16>,
      %cst_48 = arith.constant 0xFF800000 : f32
      %75 = vector.broadcast %cst_48 : f32 to vector<8x1xf32>
      %c0_49 = arith.constant 0 : index
      %c0_50 = arith.constant 0 : index
      %76 = vector.load %arg14[%c0_49, %c0_50] : memref<8x1xf32, #tpu.memory_space<vmem>>, vector<8x1xf32>
      tpu.vector_store %arg14[%c0_49, %c0_50], %75 {strides = array<i32>} : memref<8x1xf32, #tpu.memory_space<vmem>>, vector<8x1xf32>,
      %cst_51 = arith.constant 0.000000e+00 : f32
      %77 = vector.broadcast %cst_51 : f32 to vector<8x1xf32>
      %c0_52 = arith.constant 0 : index
      %c0_53 = arith.constant 0 : index
      %78 = vector.load %arg15[%c0_52, %c0_53] : memref<8x1xf32, #tpu.memory_space<vmem>>, vector<8x1xf32>
      tpu.vector_store %arg15[%c0_52, %c0_53], %77 {strides = array<i32>} : memref<8x1xf32, #tpu.memory_space<vmem>>, vector<8x1xf32>,
      %cst_54 = arith.constant 0.000000e+00 : f32
      %79 = vector.broadcast %cst_54 : f32 to vector<8x8xf32>
      %c0_55 = arith.constant 0 : index
      %c0_56 = arith.constant 0 : index
      %80 = vector.load %arg16[%c0_55, %c0_56] : memref<8x8xf32, #tpu.memory_space<vmem>>, vector<8x8xf32>
      tpu.vector_store %arg16[%c0_55, %c0_56], %79 {strides = array<i32>} : memref<8x8xf32, #tpu.memory_space<vmem>>, vector<8x8xf32>,
    } else {
    }
    %c0 = arith.constant 0 : index
    %c0_4 = arith.constant 0 : index
    %c0_5 = arith.constant 0 : index
    %8 = vector.load %arg4[%c0, %c0_4, %c0_5] : memref<1x8x32xbf16, #tpu.memory_space<vmem>>, vector<1x8x32xbf16>
    %9 = vector.shape_cast %8 : vector<1x8x32xbf16> to vector<8x32xbf16>
    %c0_6 = arith.constant 0 : index
    %c0_7 = arith.constant 0 : index
    %c0_8 = arith.constant 0 : index
    %10 = vector.load %arg7[%c0_6, %c0_7, %c0_8] : memref<1x32x16xbf16, #tpu.memory_space<vmem>>, vector<1x32x16xbf16>
    %11 = vector.shape_cast %10 : vector<1x32x16xbf16> to vector<32x16xbf16>
    %cst = arith.constant dense<0.000000e+00> : vector<8x16xf32>
    %12 = tpu.matmul %9, %11, %cst {dimension_numbers = #tpu.dot_dimension_numbers<[1], [0], [0], [1], [0, 0, 1, 1], [], []>} : vector<8x32xbf16>, vector<32x16xbf16>, vector<8x16xf32> -> vector<8x16xf32>
    %c0_9 = arith.constant 0 : index
    %c0_10 = arith.constant 0 : index
    %c0_11 = arith.constant 0 : index
    %13 = vector.load %arg8[%c0_9, %c0_10, %c0_11] : memref<1x1x16xf32, #tpu.memory_space<vmem>>, vector<1x1x16xf32>
    %14 = vector.shape_cast %13 : vector<1x1x16xf32> to vector<1x16xf32>
    %15 = vector.broadcast %14 : vector<1x16xf32> to vector<8x16xf32>
    %16 = arith.addf %12, %15 : vector<8x16xf32>
    %17 = vector.extract_strided_slice %16 {offsets = [0, 0], sizes = [8, 8], strides = [1, 1]} : vector<8x16xf32> to vector<8x8xf32>
    %18 = arith.truncf %17 : vector<8x8xf32> to vector<8x8xbf16>
    %19 = vector.extract_strided_slice %16 {offsets = [0, 8], sizes = [8, 8], strides = [1, 1]} : vector<8x16xf32> to vector<8x8xf32>
    %20 = arith.truncf %19 : vector<8x8xf32> to vector<8x8xbf16>
    %c0_12 = arith.constant 0 : index
    %c0_13 = arith.constant 0 : index
    %21 = vector.load %arg13[%c0_12, %c0_13] : memref<8x8xbf16, #tpu.memory_space<vmem>>, vector<8x8xbf16>
    %cst_14 = arith.constant dense<0.000000e+00> : vector<8x8xf32>
    %22 = tpu.matmul %21, %18, %cst_14 {dimension_numbers = #tpu.dot_dimension_numbers<[1], [1], [0], [0], [0, 0, 1, 0], [], []>} : vector<8x8xbf16>, vector<8x8xbf16>, vector<8x8xf32> -> vector<8x8xf32>
    %23 = tpu.iota {dimensions = array<i32: 0>} : vector<8x8xi32>
    %24 = tpu.iota {dimensions = array<i32: 1>} : vector<8x8xi32>
    %c8_i32 = arith.constant 8 : i32
    %25 = arith.muli %arg2, %c8_i32 : i32
    %26 = vector.broadcast %25 : i32 to vector<8x8xi32>
    %27 = arith.addi %24, %26 : vector<8x8xi32>
    %28 = arith.cmpi sge, %23, %27 : vector<8x8xi32>
    %cst_15 = arith.constant -1.000000e+30 : f32
    %29 = vector.broadcast %cst_15 : f32 to vector<8x8xf32>
    %30 = arith.select %28, %22, %29 : vector<8x8xi1>, vector<8x8xf32>
    %c0_16 = arith.constant 0 : index
    %c0_17 = arith.constant 0 : index
    %31 = vector.load %arg14[%c0_16, %c0_17] : memref<8x1xf32, #tpu.memory_space<vmem>>, vector<8x1xf32>
    %cst_18 = arith.constant dense<0xFF800000> : vector<8xf32>
    %32 = vector.multi_reduction <maximumf>, %30, %cst_18 [1] : vector<8x8xf32> to vector<8xf32>
    %33 = vector.shape_cast %32 : vector<8xf32> to vector<8x1xf32>
    %34 = arith.maximumf %31, %33 : vector<8x1xf32>
    %35 = arith.subf %31, %34 : vector<8x1xf32>
    %36 = math.exp %35 : vector<8x1xf32>
    %37 = vector.broadcast %34 : vector<8x1xf32> to vector<8x8xf32>
    %38 = arith.subf %30, %37 : vector<8x8xf32>
    %39 = math.exp %38 : vector<8x8xf32>
    %c0_19 = arith.constant 0 : index
    %c0_20 = arith.constant 0 : index
    %40 = vector.load %arg15[%c0_19, %c0_20] : memref<8x1xf32, #tpu.memory_space<vmem>>, vector<8x1xf32>
    %41 = arith.mulf %36, %40 : vector<8x1xf32>
    %cst_21 = arith.constant dense<0.000000e+00> : vector<8xf32>
    %42 = vector.multi_reduction <add>, %39, %cst_21 [1] : vector<8x8xf32> to vector<8xf32>
    %43 = vector.shape_cast %42 : vector<8xf32> to vector<8x1xf32>
    %44 = arith.addf %41, %43 : vector<8x1xf32>
    %c0_22 = arith.constant 0 : index
    %c0_23 = arith.constant 0 : index
    %45 = vector.load %arg15[%c0_22, %c0_23] : memref<8x1xf32, #tpu.memory_space<vmem>>, vector<8x1xf32>
    tpu.vector_store %arg15[%c0_22, %c0_23], %44 {strides = array<i32>} : memref<8x1xf32, #tpu.memory_space<vmem>>, vector<8x1xf32>,
    %c0_24 = arith.constant 0 : index
    %c0_25 = arith.constant 0 : index
    %46 = vector.load %arg16[%c0_24, %c0_25] : memref<8x8xf32, #tpu.memory_space<vmem>>, vector<8x8xf32>
    %47 = vector.broadcast %36 : vector<8x1xf32> to vector<8x8xf32>
    %48 = arith.mulf %47, %46 : vector<8x8xf32>
    %49 = arith.truncf %39 : vector<8x8xf32> to vector<8x8xbf16>
    %cst_26 = arith.constant dense<0.000000e+00> : vector<8x8xf32>
    %50 = tpu.matmul %49, %20, %cst_26 {dimension_numbers = #tpu.dot_dimension_numbers<[1], [0], [0], [1], [0, 0, 1, 1], [], []>} : vector<8x8xbf16>, vector<8x8xbf16>, vector<8x8xf32> -> vector<8x8xf32>
    %51 = arith.addf %48, %50 : vector<8x8xf32>
    %c0_27 = arith.constant 0 : index
    %c0_28 = arith.constant 0 : index
    %52 = vector.load %arg16[%c0_27, %c0_28] : memref<8x8xf32, #tpu.memory_space<vmem>>, vector<8x8xf32>
    tpu.vector_store %arg16[%c0_27, %c0_28], %51 {strides = array<i32>} : memref<8x8xf32, #tpu.memory_space<vmem>>, vector<8x8xf32>,
    %c0_29 = arith.constant 0 : index
    %c0_30 = arith.constant 0 : index
    %53 = vector.load %arg14[%c0_29, %c0_30] : memref<8x1xf32, #tpu.memory_space<vmem>>, vector<8x1xf32>
    tpu.vector_store %arg14[%c0_29, %c0_30], %34 {strides = array<i32>} : memref<8x1xf32, #tpu.memory_space<vmem>>, vector<8x1xf32>,
    %c0_i32_31 = arith.constant 0 : i32
    %54 = arith.cmpi eq, %arg2, %c0_i32_31 : i32
    %55 = arith.extui %54 : i1 to i32
    %c0_i32_32 = arith.constant 0 : i32
    %56 = arith.cmpi ne, %55, %c0_i32_32 : i32
    scf.if %56 {
      %c0_35 = arith.constant 0 : index
      %c0_36 = arith.constant 0 : index
      %62 = vector.load %arg15[%c0_35, %c0_36] : memref<8x1xf32, #tpu.memory_space<vmem>>, vector<8x1xf32>
      %cst_37 = arith.constant 1.000000e+00 : f32
      %63 = vector.broadcast %cst_37 : f32 to vector<8x1xf32>
      %64 = arith.divf %63, %62 : vector<8x1xf32>
      %65 = vector.broadcast %64 : vector<8x1xf32> to vector<8x8xf32>
      %66 = arith.mulf %39, %65 : vector<8x8xf32>
      %67 = arith.truncf %66 : vector<8x8xf32> to vector<8x8xbf16>
      %c0_38 = arith.constant 0 : index
      %c0_39 = arith.constant 0 : index
      %c0_40 = arith.constant 0 : index
      %c0_41 = arith.constant 0 : index
      %68 = vector.load %arg12[%c0_38, %c0_39, %c0_40, %c0_41] : memref<1x1x8x8xbf16, #tpu.memory_space<vmem>>, vector<1x1x8x8xbf16>
      %69 = vector.shape_cast %68 : vector<1x1x8x8xbf16> to vector<8x8xbf16>
      %70 = vector.shape_cast %67 : vector<8x8xbf16> to vector<1x1x8x8xbf16>
      tpu.vector_store %arg12[%c0_38, %c0_39, %c0_40, %c0_41], %70 {strides = array<i32>} : memref<1x1x8x8xbf16, #tpu.memory_space<vmem>>, vector<1x1x8x8xbf16>,
      %c0_42 = arith.constant 0 : index
      %c0_43 = arith.constant 0 : index
      %71 = vector.load %arg16[%c0_42, %c0_43] : memref<8x8xf32, #tpu.memory_space<vmem>>, vector<8x8xf32>
      %72 = vector.broadcast %64 : vector<8x1xf32> to vector<8x8xf32>
      %73 = arith.mulf %71, %72 : vector<8x8xf32>
      %74 = arith.truncf %73 : vector<8x8xf32> to vector<8x8xbf16>
      %c0_44 = arith.constant 0 : index
      %c0_45 = arith.constant 0 : index
      %75 = vector.load %arg17[%c0_44, %c0_45] : memref<8x32xf32, #tpu.memory_space<vmem>>, vector<8x32xf32>
      %c0_46 = arith.constant 0 : index
      %c0_47 = arith.constant 0 : index
      %c0_48 = arith.constant 0 : index
      %76 = vector.load %arg9[%c0_46, %c0_47, %c0_48] : memref<1x8x32xbf16, #tpu.memory_space<vmem>>, vector<1x8x32xbf16>
      %77 = vector.shape_cast %76 : vector<1x8x32xbf16> to vector<8x32xbf16>
      %cst_49 = arith.constant dense<0.000000e+00> : vector<8x32xf32>
      %78 = tpu.matmul %74, %77, %cst_49 {dimension_numbers = #tpu.dot_dimension_numbers<[1], [0], [0], [1], [0, 0, 1, 1], [], []>} : vector<8x8xbf16>, vector<8x32xbf16>, vector<8x32xf32> -> vector<8x32xf32>
      %79 = arith.addf %75, %78 : vector<8x32xf32>
      %c0_50 = arith.constant 0 : index
      %c0_51 = arith.constant 0 : index
      %80 = vector.load %arg17[%c0_50, %c0_51] : memref<8x32xf32, #tpu.memory_space<vmem>>, vector<8x32xf32>
      tpu.vector_store %arg17[%c0_50, %c0_51], %79 {strides = array<i32>} : memref<8x32xf32, #tpu.memory_space<vmem>>, vector<8x32xf32>,
    } else {
    }
    %c3_i32 = arith.constant 3 : i32
    %57 = arith.cmpi eq, %arg1, %c3_i32 : i32
    %c0_i32_33 = arith.constant 0 : i32
    %58 = arith.cmpi eq, %arg2, %c0_i32_33 : i32
    %59 = arith.andi %57, %58 : i1
    %60 = arith.extui %59 : i1 to i32
    %c0_i32_34 = arith.constant 0 : i32
    %61 = arith.cmpi ne, %60, %c0_i32_34 : i32
    scf.if %61 {
      %c0_35 = arith.constant 0 : index
      %c0_36 = arith.constant 0 : index
      %62 = vector.load %arg17[%c0_35, %c0_36] : memref<8x32xf32, #tpu.memory_space<vmem>>, vector<8x32xf32>
      %c0_37 = arith.constant 0 : index
      %c0_38 = arith.constant 0 : index
      %63 = vector.load %arg10[%c0_37, %c0_38] : memref<1x32xf32, #tpu.memory_space<vmem>>, vector<1x32xf32>
      %64 = vector.broadcast %63 : vector<1x32xf32> to vector<8x32xf32>
      %65 = arith.addf %62, %64 : vector<8x32xf32>
      %c0_39 = arith.constant 0 : index
      %c0_40 = arith.constant 0 : index
      %c0_41 = arith.constant 0 : index
      %66 = vector.load %arg11[%c0_39, %c0_40, %c0_41] : memref<1x8x32xf32, #tpu.memory_space<vmem>>, vector<1x8x32xf32>
      %67 = vector.shape_cast %66 : vector<1x8x32xf32> to vector<8x32xf32>
      %68 = vector.shape_cast %65 : vector<8x32xf32> to vector<1x8x32xf32>
      tpu.vector_store %arg11[%c0_39, %c0_40, %c0_41], %68 {strides = array<i32>} : memref<1x8x32xf32, #tpu.memory_space<vmem>>, vector<1x8x32xf32>,
    } else {
    }
    return
  }
  func.func @transform_0(%arg0: i32, %arg1: i32, %arg2: i32) -> (i32, i32, i32) {
    %c0_i32 = arith.constant 0 : i32
    %c0_i32_0 = arith.constant 0 : i32
    %c0_i32_1 = arith.constant 0 : i32
    return %arg0, %c0_i32, %c0_i32_0 : i32, i32, i32
  }
  func.func @transform_1(%arg0: i32, %arg1: i32, %arg2: i32) -> (i32, i32, i32) {
    %c0_i32 = arith.constant 0 : i32
    %c0_i32_0 = arith.constant 0 : i32
    return %arg0, %arg2, %c0_i32 : i32, i32, i32
  }
  func.func @transform_2(%arg0: i32, %arg1: i32, %arg2: i32) -> (i32, i32, i32) {
    %c0_i32 = arith.constant 0 : i32
    %c0_i32_0 = arith.constant 0 : i32
    %c0_i32_1 = arith.constant 0 : i32
    return %arg1, %c0_i32, %c0_i32_0 : i32, i32, i32
  }
  func.func @transform_3(%arg0: i32, %arg1: i32, %arg2: i32) -> (i32, i32, i32) {
    %c0_i32 = arith.constant 0 : i32
    %c0_i32_0 = arith.constant 0 : i32
    %c0_i32_1 = arith.constant 0 : i32
    return %arg1, %c0_i32, %c0_i32_0 : i32, i32, i32
  }
  func.func @transform_4(%arg0: i32, %arg1: i32, %arg2: i32) -> (i32, i32, i32) {
    %c0_i32 = arith.constant 0 : i32
    %c0_i32_0 = arith.constant 0 : i32
    %c0_i32_1 = arith.constant 0 : i32
    return %arg1, %c0_i32, %c0_i32_0 : i32, i32, i32
  }
  func.func @transform_5(%arg0: i32, %arg1: i32, %arg2: i32) -> (i32, i32, i32) {
    %c0_i32 = arith.constant 0 : i32
    %c0_i32_0 = arith.constant 0 : i32
    %c0_i32_1 = arith.constant 0 : i32
    return %arg1, %c0_i32, %c0_i32_0 : i32, i32, i32
  }
  func.func @transform_6(%arg0: i32, %arg1: i32, %arg2: i32) -> (i32, i32, i32) {
    %c0_i32 = arith.constant 0 : i32
    %c0_i32_0 = arith.constant 0 : i32
    %c0_i32_1 = arith.constant 0 : i32
    return %arg1, %c0_i32, %c0_i32_0 : i32, i32, i32
  }
  func.func @transform_7(%arg0: i32, %arg1: i32, %arg2: i32) -> (i32, i32) {
    %c0_i32 = arith.constant 0 : i32
    %c0_i32_0 = arith.constant 0 : i32
    %c0_i32_1 = arith.constant 0 : i32
    return %c0_i32, %c0_i32_0 : i32, i32
  }
  func.func @transform_8(%arg0: i32, %arg1: i32, %arg2: i32) -> (i32, i32, i32) {
    %c0_i32 = arith.constant 0 : i32
    %c0_i32_0 = arith.constant 0 : i32
    %c0_i32_1 = arith.constant 0 : i32
    return %arg0, %c0_i32, %c0_i32_0 : i32, i32, i32
  }
  func.func @transform_9(%arg0: i32, %arg1: i32, %arg2: i32) -> (i32, i32, i32, i32) {
    %c0_i32 = arith.constant 0 : i32
    %c0_i32_0 = arith.constant 0 : i32
    %c0_i32_1 = arith.constant 0 : i32
    return %arg0, %arg1, %c0_i32, %c0_i32_0 : i32, i32, i32, i32
  }
}

</mosaic_0001>

<bundles_post_ra>
// kernel: tpu_custom_call.1
= control target key start
LH: loop header
LB: loop body
LE: loop exit
PB: predicated region body
PF: predicated region fallthrough
CT: control target
= control target key end

     0   :  { %s1586_s0 = inlined_call_operand.vmem [shape: bf16[2,8,32], index: 0, kind: input, shape index: {}]   ;;  %s1587_s1 = inlined_call_operand.vmem [shape: bf16[2,8,32], index: 1, kind: input, shape index: {}]   ;;  %s1588_s2 = inlined_call_operand.vmem [shape: bf16[4,32,8], index: 2, kind: input, shape index: {}]   ;;  %s1589_s3 = inlined_call_operand.vmem [shape: f32[4,1,8], index: 3, kind: input, shape index: {}]   ;;  %s1590_s4 = inlined_call_operand.vmem [shape: bf16[4,32,16], index: 4, kind: input, shape index: {}]   ;;  %s1591_s5 = inlined_call_operand.vmem [shape: f32[4,1,16], index: 5, kind: input, shape index: {}]   ;;  %s1592_s6 = inlined_call_operand.vmem [shape: bf16[4,8,32], index: 6, kind: input, shape index: {}]   ;;  %s1593_s7 = inlined_call_operand.vmem [shape: f32[1,32], index: 7, kind: input, shape index: {}]   ;;  %s1594_s8 = inlined_call_operand.hbm [shape: f32[2,8,32], index: 8, kind: output, shape index: {0}]   ;;  %s1595_s9 = inlined_call_operand.hbm [shape: bf16[2,4,8,8], index: 9, kind: output, shape index: {1}]  }
   0x1   :  { %1618 = sst [smem:[#allocation30_spill]] %s1586_s0 }
   0x2   :  { %1619 = sst [smem:[#allocation31_spill]] %s1594_s8 }
   0x3   :  { %1620 = sst [smem:[#allocation32_spill]] %s1595_s9 }
   0x4   :  { %15 = vsyncpa [#allocation8], 0 }
   0x5   :  { %17 = vsyncpa [#allocation8 + $0x1], 0 }
   0x6   :  { %18 = vsyncpa [#allocation10], 0 }
   0x7   :  { %20 = vsyncpa [#allocation10 + $0x1], 0  ;;  %s1314_s30 = smov 0   ;;  %s1316_s10 = smov 0  }
   0x8   :  { %s1318_s11 = smov 0   ;;  %s1320_s12 = smov 0  }
   0x9   :  { %s1322_s13 = smov 0   ;;  %s1324_s14 = smov 0  }
   0xa   :  { %s1326_s15 = smov 0   ;;  %s1328_s16 = smov 0  }
   0xb   :  { %s1330_s17 = smov 0   ;;  %s1332_s18 = smov 0  }
   0xc   :  { %s1334_s19 = smov 0  }
   0xd LB: > { %1621 = sst [smem:[#allocation13_spill]] %s1217_s30  ;;  %s939_s20 = sadd.s32 4294967295, %s1257_s19   ;;  %s1257_s19 = sphi %s1334_s19, %s26_s19   ;;  %s1253_s18 = sphi %s1332_s18, %s1667_s18   ;;  %s1249_s17 = sphi %s1330_s17, %s1666_s17   ;;  %s1245_s16 = sphi %s1328_s16, %s1665_s16   ;;  %s1241_s15 = sphi %s1326_s15, %s1664_s15   ;;  %s1237_s14 = sphi %s1324_s14, %s1663_s14   ;;  %s1233_s13 = sphi %s1322_s13, %s1662_s13   ;;  %s1229_s12 = sphi %s1320_s12, %s1661_s12   ;;  %s1225_s11 = sphi %s1318_s11, %s1660_s11   ;;  %s1221_s10 = sphi %s1316_s10, %s1659_s10   ;;  %s1217_s30 = sphi %s1314_s30, %s1658_s30  }
   0xe   : > { %1622 = sst [smem:[#allocation14_spill]] %s1221_s10  ;;  %s940_s21 = sadd.s32 4294967294, %s1257_s19  }
   0xf   : > { %1623 = sst [smem:[#allocation15_spill]] %s1225_s11  ;;  %s41_s22 = sadd.s32 1, %s1249_s17 }
  0x10   : > { %1624 = sst [smem:[#allocation16_spill]] %s1229_s12  ;;  %s45_s23 = sadd.s32 1, %s1253_s18 }
  0x11   : > { %1625 = sst [smem:[#allocation17_spill]] %s1233_s13  ;;  %p43_p0 = scmp.ge.s32.totalorder %s41_s22, 4 }
  0x12   : > { %1626 = sst [smem:[#allocation18_spill]] %s1237_s14  ;;  %s257_s24 = sadd.s32 1, %s1237_s14 }
  0x13   : > { %1627 = sst [smem:[#allocation19_spill]] %s1249_s17  ;;  %p267_p1 = scmp.ne.s32.totalorder %s1237_s14, %s1233_s13 }
  0x14   : > { %1628 = sst [smem:[#allocation20_spill]] %s1253_s18  ;;  %p1376_p2 = scmp.eq.s32.totalorder %s939_s20, 7 }
  0x15   : > { %1629 = sst [smem:[#allocation21_spill]] %s1257_s19  ;;  %s1669_s22 = smov (%p43_p0, %s41_s22), 0 }
  0x16   : > { %1631 = sst [smem:[#allocation22_spill]] %s1669_s22  ;;  %s1671_s23 = smov (!%p43_p0, %s45_s23), %s1253_s18 }
  0x17   : > { %p1385_p3 = por %p1376_p2, %p267_p1  ;;  %p273_p4 = scmp.ne.s32.totalorder %s1233_s13, %s1229_s12 }
  0x18   : > { %p47_p5 = scmp.ge.s32.totalorder %s1671_s23, 2  ;;  %p1391_p6 = scmp.eq.s32.totalorder %s940_s21, 7 }
  0x19   : > { %s1632_s26 = scalar_select %p1385_p3, 1, 0 }
  0x1a   : > { %s281_s28 = ssub.s32 %s1249_s17, %s1669_s22  ;;  %s285_s29 = sadd.s32 1, %s1225_s11 }
  0x1b   : > { %1633 = sst [smem:[#allocation23_spill]] %s1632_s26  ;;  %s1673_s23 = smov (%p47_p5, %s1671_s23), 0 }
  0x1c   : > { %1635 = sst [smem:[#allocation24_spill]] %s1673_s23  ;;  %p1402_p7 = por %p1391_p6, %p273_p4 }
  0x1d   : > { %p295_p8 = scmp.ne.s32.totalorder %s1225_s11, %s1221_s10  ;;  %s254_s12 = ssub.s32 %s1253_s18, %s1673_s23 }
  0x1e   : > { %s1636_s20 = scalar_select %p1402_p7, 1, 0 }
  0x1f   : > { %p301_p9 = scmp.ne.s32.totalorder %s1221_s10, %s1217_s30  ;;  %p255_p10 = scmp.eq.s32.totalorder %s254_s12, 0 }
  0x20   : > { %1637 = sst [smem:[#allocation25_spill]] %s1636_s20  ;;  %s282_s21 = sor.u32 %s281_s28, %s254_s12 }
  0x21   : > { %p283_p11 = scmp.eq.s32.totalorder %s282_s21, 0  ;;  %p1414_p12 = por %p295_p8, %p1376_p2 }
  0x22   : > { %s1419_s22 = scalar_select %p255_p10, %s1237_s14, %s257_s24  }
  0x23   : > { %s1638_s9 = scalar_select %p1414_p12, 1, 0 }
  0x24   : > { %1640 = sst [smem:[#allocation27_spill]] %s1419_s22  ;;  %p1426_p13 = por %p301_p9, %p1391_p6 }
  0x25   : > { %1639 = sst [smem:[#allocation26_spill]] %s1638_s9  ;;  %p943_p0 = scmp.ge.s32.totalorder %s1257_s19, 1 }
  0x26   : > { %s1422_s17 = scalar_select %p283_p11, %s1225_s11, %s285_s29  }
  0x27   : > { %s1642_s8 = scalar_select %p1426_p13, 1, 0 }
  0x28   : > { %1641 = sst [smem:[#allocation28_spill]] %s1422_s17  ;;  %p375_p1 = scmp.lt.s32.totalorder %s1257_s19, 9 }
  0x29   : > { %1643 = sst [smem:[#allocation29_spill]] %s1642_s8 }
  0x2a   : > { %p376_p4 = pnand %p943_p0, %p375_p1 }
  0x2b   : > { %s1603_s12 = sand.u32 (!%p376_p4), 1, %s1233_s13   ;;  %s1604_s24 = sand.u32 (!%p376_p4), 1, %s1221_s10  }
  0x2c   : > { %379 = sbr.rel (%p376_p4) target bundleno = 1014 (0x3f6), region = 52  ;;  %s1436_s25 = sshll.u32 (!%p376_p4), %s1603_s12, 3 }
  0x2d   : > { %s1440_s27 = sshll.u32 (!%p376_p4), %s1604_s24, 2  ;;  %p442_p2 = scmp.lt.s32.totalorder (!%p376_p4), %s1245_s16, 1 }
  0x2e   : > { %p453_p5 = scmp.lt.s32.totalorder (!%p376_p4), %s1241_s15, 3  ;;  %p474_p6 = scmp.eq.s32.totalorder (!%p376_p4), %s1241_s15, 0 }
  0x2f   : > { %s1644_s0 = sld [smem:[#allocation30_spill]] (!%p376_p4)  ;;  %s434_s8 = scalar_lea.vmem (!%p376_p4), [#allocation7], %s1436_s25 }
  0x30   : > { %s441_s11 = scalar_lea.vmem (!%p376_p4), [#allocation9], %s1440_s27 }
  0x31   : > { %s443_s28 = scalar_select %p442_p2, %s1245_s16, 1  ;;  %vm480_vm0 = vcmask (%p474_p6), 261120   ;;  %v1259_v0 = vmov (%p474_p6), 0.0  }
  0x32   : > { %s1447_s29 = scalar_select %p453_p5, %s1241_s15, 3  ;;  %481 = vst.msk [vmem:[#allocation6] sm:$0xff] (%p474_p6), %vm480_vm0, %v1259_v0 }
  0x33   : > { %s946_s21 = sshll.u32 %s443_s28, 2 }
  0x34   : > { %s452_s14 = scalar_lea.vmem %s1587_s1, %s946_s21  ;;  %s983_s17 = sshll.u32 %s1447_s29, 4 }
  0x35   : > { %s445_s12 = scalar_lea.vmem %s1644_s0, %s946_s21  ;;  %s460_s30 = scalar_lea.vmem %s1589_s3, %s1447_s29 }
  0x36   : > { %s457_s9 = scalar_lea.vmem %s1588_s2, %s983_s17  ;;  %s465_s28 = scalar_lea.vmem %s1590_s4, %s983_s17 }
  0x37   : > { %s468_s23 = scalar_lea.vmem %s1591_s5, %s1447_s29  ;;  %s952_s0 = sshll.u32 %s1447_s29, 2 }
  0x38   : > { %s1474_s21 = scalar_lea.vmem %s1592_s6, %s952_s0  ;;  %479 = sbr.rel (!%p474_p6) target bundleno = 61 (0x3d), region = 56 }
  0x3d PF: > { %v987_v1 = vld [vmem:[%s457_s9 + $0x8] sm:$0xff]  ;;  %v986_v3 = vld [vmem:[%s457_s9] sm:$0xff]  ;;  %vm506_vm1 = vcmask 261120   ;;  %vm530_vm2 = vcmask 64512   ;;  %v1260_v7 = vmov 0.0   ;;  %vm525_vm3 = vcmask 60416  }
  0x3e   : > { %v989_v2 = vld [vmem:[%s465_s28 + $0x8] sm:$0xff]  ;;  %516 = vmatpush.bf16.msra.mxu0 %v987_v1  ;;  %v988_v4 = vld [vmem:[%s465_s28] sm:$0xff]  ;;  %531 = vst.msk [vmem:[#allocation5] sm:$0xff] %vm530_vm2, %v1260_v7  ;;  %s1261_s0 = smov 120   ;;  %vm639_vm4 = vcmask 1043456   ;;  %vm527_vm5 = vcmask 7168   ;;  %v592_v24 = vlaneseq }
  0x3f   : > { %563 = vmatpush.bf16.msra.mxu1 %v989_v2  ;;  %v485_v5 = vld [vmem:[%s445_s12] sm:$0xf]  ;;  %v1262_v23 = vmov -inf   ;;  %529 = vst.msk [vmem:[#allocation4] sm:$0xff] %vm527_vm5, %v1260_v7  ;;  %v1263_v31 = vmov 0   ;;  %p713_p8 = scmp.eq.s32.totalorder %s1241_s15, 3 }
  0x40   : > { %v532_v6 = vld [vmem:[%s452_s14] sm:$0xf]  ;;  %528 = vst.msk [vmem:[#allocation3] sm:$0xff] %vm527_vm5, %v1262_v23  ;;  %v593_v25 = vshrl.u32 %v592_v24, 7  ;;  %v595_v26 = vand.u32 127, %v592_v24  ;;  %1096 = vset.pattern.permute.xlu0 %v1263_v31  ;;  %1097 = vset.pattern.permute.xlu2 %v1263_v31 }
  0x41   : > { %v1098_v8 = vld [vmem:[%s460_s30] ss:$0 sm:$0xff] }
  0x42   : > { %517 = vmatpush.bf16.msra.mxu0 %v986_v3  ;;  %v1099_v9 = vld [vmem:[%s468_s23] ss:$0 sm:$0xff]  ;;  %vm599_vm6 = vcmp.ge.s32.totalorder %v593_v25, %v595_v26 }
  0x43   : > { %564 = vmatpush.bf16.msra.mxu1 %v988_v4  ;;  %v691_v45 = vld [vmem:[%s1474_s21] sm:$0xf] }
  0x44   : > { %v696_v46 = vsel %vm639_vm4, %v691_v45, 0 }
  0x45   : > { %962 = vmatmul.msk.bf16.vlgmr.msra.gmra.mxu0 %vm506_vm1, %v485_v5  ;;  %v625_v51 = vld [vmem:[#allocation5] sm:$0xff] }
  0x46   : > { %971 = vmatmul.msk.bf16.vlgmr.msra.gmra.mxu1 %vm506_vm1, %v532_v6  ;;  %v617_v44 = vld [vmem:[#allocation4] sm:$0xff] }
  0x47   : > { %v601_v32 = vld [vmem:[#allocation3] sm:$0xff] }
  0xc2   : > { %v519_v10 = vpop.f32.mrf.mxu0 }
  0xc3   : > { %v566_v11 = vpop.f32.mrf.mxu1  ;;  %v520_v12 = vadd.f32 %v1098_v8, %v519_v10 }
  0xc4   : > { %v567_v13 = vadd.f32 %v1099_v9, %v566_v11  ;;  %v690_v9 = vld [vmem:[#allocation6] sm:$0xff] }
  0xc5   : > { %v523_v14 = vmul.f32 0.35355338, %v520_v12 }
  0xc6   : > { %v570_v15 = vpack.c.bf16 %v567_v13, %v567_v13 }
  0xc7   : > { %v524_v16 = vpack.c.bf16 %v523_v14, %v523_v14  ;;  %v1106_v14 = vld [vmem:[%s1593_s7] ss:$0 sm:$0xff] (%p713_p8) }
  0xc8   : > { %634 = vrot.lane.b32.xlu1 %v570_v15, %s1261_s0  ;;  %v577_v17 = vsel %vm530_vm2, %v570_v15, 0 }
  0xc9   : > { %586 = vmatpush.bf16.xpose.msra.mxu2 %v577_v17  ;;  %526 = vst.msk [vmem:[#allocation2] sm:$0xf] %vm525_vm3, %v524_v16 }
  0xca   : > { %v521_v18 = vpop.f32.mrf.mxu0 }
  0xcb   : > { %v568_v19 = vpop.f32.mrf.mxu1 }
  0xd0   : > { %v571_v20 = vld [vmem:[#allocation2] sm:$0xf] }
  0xd1   : > { %972 = vmatmul.msk.bf16.vlgmr.msra.gmra.mxu2 %vm530_vm2, %v571_v20 }
 0x13a   : > { %v635_v21 = vpop.permute.xlu1 %634 }
 0x13b   : > { %v641_v22 = vsel %vm639_vm4, %v635_v21, 0 }
 0x13c   : > { %650 = vmatpush.bf16.msra.mxu3 %v641_v22 }
 0x140   : > { %705 = vmatpush.bf16.msrb.mxu3 %v696_v46 }
 0x154   : > { %v588_v27 = vpop.f32.mrf.mxu2 }
 0x155   : > { %v600_v28 = vsel %vm599_vm6, %v588_v27, -1e+30 }
 0x156   : > { %v602_v29 = vsel %vm530_vm2, %v600_v28, -inf }
 0x157   : > { %603 = vmax.xlane.f32.xlu0 %v602_v29 }
 0x15c   : > { %v590_v30 = vpop.f32.mrf.mxu2 }
 0x1ca   : > { %v604_v33 = vpop.xlane.xlu0 %603 }
 0x1cb   : > { %v605_v34 = vmax.f32 %v601_v32, %v604_v33 }
 0x1cd   : > { %v606_v35 = vsub.f32 %v601_v32, %v605_v34  ;;  %658 = vst.msk [vmem:[#allocation3] sm:$0xff] %vm527_vm5, %v605_v34  ;;  %611 = vperm.xlu0 %1096, %v605_v34  }
 0x1cf   : > { %v607_v36 = vmul.f32 1.442695, %v606_v35 }
 0x1d1   : > { %1100 = vpow2.f32 %v607_v36 }
 0x1d7   : > { %v1101_v37 = vpop.eup %1100 }
 0x1d8   : > { %628 = vperm.xlu2 %1097, %v1101_v37   ;;  %v618_v47 = vmul.f32 %v1101_v37, %v617_v44 }
 0x232   : > { %v629_v52 = vpop.permute.xlu2 %628 }
 0x233   : > { %v631_v53 = vmul.f32 %v629_v52, %v625_v51 }
 0x23f   : > { %v612_v38 = vpop.permute.xlu0 %611 }
 0x240   : > { %v614_v39 = vsub.f32 %v600_v28, %v612_v38 }
 0x242   : > { %v615_v40 = vmul.f32 1.442695, %v614_v39 }
 0x244   : > { %1102 = vpow2.f32 %v615_v40 }
 0x24a   : > { %v1103_v41 = vpop.eup %1102 }
 0x24b   : > { %v619_v42 = vsel %vm530_vm2, %v1103_v41, 0.0  ;;  %v632_v43 = vpack.c.bf16 %v1103_v41, %v1103_v41 }
 0x24c   : > { %620 = vadd.xlane.f32.xlu1 %v619_v42 }
 0x24d   : > { %973 = vmatmul.msk.bf16.vlgmr.msra.gmra.mxu3 %vm530_vm2, %v632_v43 }
 0x2bf   : > { %v621_v48 = vpop.xlane.xlu1 %620 }
 0x2c0   : > { %v622_v49 = vadd.f32 %v621_v48, %v618_v47 }
 0x2c2   : > { %624 = vst.msk [vmem:[#allocation4] sm:$0xff] %vm527_vm5, %v622_v49 }
 0x2c9   : > { %v662_v50 = vld [vmem:[#allocation4] sm:$0xff] }
 0x2ca   : > { %1104 = vrcp.f32 %v662_v50  ;;  %v674_v59 = vand.u32 2147483648, %v662_v50  ;;  %v672_v61 = vand.u32 2147483647, %v662_v50  ;;  %vm668_vm8 = vweird.f32 %v662_v50 }
 0x2cc   : > { %v675_v0 = vor.u32 1.1754944e-38, %v674_v59  ;;  %vm673_vm10 = vcmp.eq.f32.partialorder %v672_v61, 8.507059e+37 }
 0x2d0   : > { %v1105_v54 = vpop.eup %1104  ;;  %v652_v55 = vpop.f32.mrf.mxu3 }
 0x2d1   : > { %v656_v56 = vadd.f32 %v652_v55, %v631_v53  ;;  %v664_v57 = vmul.f32 %v1105_v54, %v662_v50  ;;  %vm669_vm7 = vweird.f32 %v1105_v54 }
 0x2d2   : > { %vm670_vm9 = vmor %vm668_vm8, %vm669_vm7 }
 0x2d3   : > { %657 = vst.msk [vmem:[#allocation5] sm:$0xff] %vm530_vm2, %v656_v56  ;;  %v665_v58 = vsub.f32 1.0, %v664_v57 }
 0x2d5   : > { %v666_v60 = vmul.f32 %v1105_v54, %v665_v58 }
 0x2d7   : > { %v667_v62 = vadd.f32 %v1105_v54, %v666_v60 }
 0x2d8   : > { %v654_v63 = vpop.f32.mrf.mxu3 }
 0x2d9   : > { %v671_v1 = vsel %vm670_vm9, %v1105_v54, %v667_v62 }
 0x2da   : > { %v676_v2 = vsel %vm673_vm10, %v675_v0, %v671_v1  ;;  %v687_v3 = vld [vmem:[#allocation5] sm:$0xff] }
 0x2db   : > { %680 = vperm.xlu2 %1097, %v676_v2  }
 0x335   : > { %v681_v4 = vpop.permute.xlu2 %680 }
 0x336   : > { %v683_v5 = vmul.f32 %v1103_v41, %v681_v4  ;;  %v688_v6 = vmul.f32 %v687_v3, %v681_v4 }
 0x338   : > { %v684_v7 = vpack.c.bf16 %v683_v5, %v683_v5  ;;  %v689_v8 = vpack.c.bf16 %v688_v6, %v688_v6 }
 0x33a   : > { %686 = vst.msk [vmem:[%s441_s11] sm:$0xf] %vm525_vm3, %v684_v7  ;;  %974 = vmatmul.msk.bf16.vlgmr.msrb.gmra.mxu3 %vm530_vm2, %v689_v8 }
 0x3bd   : > { %v707_v10 = vpop.f32.mrf.mxu3 }
 0x3be   : > { %v711_v11 = vadd.f32 %v707_v10, %v690_v9 }
 0x3c0   : > { %712 = vst.msk [vmem:[#allocation6] sm:$0xff] %vm506_vm1, %v711_v11 }
 0x3c1   : > { %717 = sbr.rel (!%p713_p8) target bundleno = 971 (0x3cb), region = 68 }
 0x3c5   : > { %v709_v12 = vpop.f32.mrf.mxu3 }
 0x3c7   : > { %v718_v13 = vld [vmem:[#allocation6] sm:$0xff] }
 0x3c8   : > { %v723_v15 = vadd.f32 %v1106_v14, %v718_v13 }
 0x3ca   : > { %724 = vst.msk [vmem:[%s434_s8] sm:$0xff] %vm506_vm1, %v723_v15 }
 0x3cb PF: > { %s1645_s10 = sld [smem:[#allocation17_spill]]  ;;  %s978_s14 = sshll.u32 %s1245_s16, 3 }
 0x3cc   : > { %s1647_s26 = sld [smem:[#allocation31_spill]]  ;;  %s743_s12 = sshll.u32 %s434_s8, 4  ;;  %s744_s12 = int_to_ptr.vmem [resolvable:$true] %s743_s12 }
 0x3d1   : > { %s1648_s28 = sand.u32 1, %s1645_s10  }
 0x3d2   : > { %s741_s20 = scalar_lea.hbm %s1647_s26, %s978_s14  ;;  %s726_s18 = scalar_lea.sflag [#allocation8], %s1648_s28 }
 0x3d3   : > { %s745_s29 = sshll.u32 %s741_s20, 4  ;;  %s1127_s0 = scalar_lea.hbm %s1647_s26, 16  ;;  %s746_s29 = int_to_ptr.hbm [resolvable:$true] %s745_s29 }
 0x3d4   : > { %s1121_s23 = sshra.s32 %s746_s29, 4  ;;  %s1122_s23 = int_to_ptr.hbm [resolvable:$true] %s1121_s23 }
 0x3d5   : > { %s1123_s22 = scalar_lea.hbm %s1122_s23, 8  ;;  %p1128_p0 = scmp.lt.s32.totalorder %s1122_s23, %s1647_s26 }
 0x3d6   : > { %p1124_p9 = scmp.ne.s32.totalorder %s1122_s23, %s1123_s22  ;;  %p1129_p1 = scmp.lt.s32.totalorder %s1127_s0, %s1123_s22 }
 0x3d8   : > { %p1125_p10 = pnand %p1124_p9, %p1385_p3  ;;  %p1130_p4 = por %p1129_p1, %p1128_p0 }
 0x3da   : > { %p1126_p11 = pneg %p1125_p10 }
 0x3dc   : > { %p1131_p2 = pnand %p1130_p4, %p1126_p11 }
 0x3de   : > { %1134 = shalt.err (!%p1131_p2)
}
 0x3df   : > { %s1649_s25 = sld [smem:[#allocation14_spill]]  ;;  %s979_s10 = sshll.u32 %s1245_s16, 2 }
 0x3e0   : > { %991 = dma.vmem_to_hbm [thread:$0]  (%p1385_p3), %s744_s12, 128, %s746_s29, %s726_s18  }
 0x3e1   : > { %s759_s14 = sshll.u32 %s441_s11, 4  ;;  %s755_s17 = sadd.s32 %s1241_s15, %s979_s10  ;;  %s760_s14 = int_to_ptr.vmem [resolvable:$true] %s759_s14 }
 0x3e2   : > { %s980_s19 = sshll.u32 %s755_s17, 2  ;;  %s1651_s23 = sld [smem:[#allocation32_spill]] }
 0x3e5   : > { %s1652_s21 = sand.u32 1, %s1649_s25  }
 0x3e6   : > { %s731_s13 = scalar_lea.sflag [#allocation10], %s1652_s21 }
 0x3e8   : > { %s757_s22 = scalar_lea.hbm %s1651_s23, %s980_s19  ;;  %s1155_s15 = scalar_lea.hbm %s1651_s23, 32 }
 0x3e9   : > { %s761_s24 = sshll.u32 %s757_s22, 4  ;;  %s762_s24 = int_to_ptr.hbm [resolvable:$true] %s761_s24 }
 0x3ea   : > { %s1149_s0 = sshra.s32 %s762_s24, 4  ;;  %s1150_s0 = int_to_ptr.hbm [resolvable:$true] %s1149_s0 }
 0x3eb   : > { %s1151_s9 = scalar_lea.hbm %s1150_s0, 4  ;;  %p1156_p8 = scmp.lt.s32.totalorder %s1150_s0, %s1651_s23 }
 0x3ec   : > { %p1152_p5 = scmp.ne.s32.totalorder %s1150_s0, %s1151_s9  ;;  %p1157_p9 = scmp.lt.s32.totalorder %s1155_s15, %s1151_s9 }
 0x3ee   : > { %p1153_p3 = pnand %p1152_p5, %p1414_p12  ;;  %p1158_p10 = por %p1157_p9, %p1156_p8 }
 0x3f0   : > { %p1154_p6 = pneg %p1153_p3 }
 0x3f2   : > { %p1159_p11 = pnand %p1158_p10, %p1154_p6 }
 0x3f4   : > { %1162 = shalt.err (!%p1159_p11)
}
 0x3f5   : > { %992 = dma.vmem_to_hbm [thread:$0]  (%p1414_p12), %s760_s14, 64, %s762_s24, %s731_s13  }
 0x3f6 PF: > { %s1653_s29 = sld [smem:[#allocation21_spill]] }
 0x3f7   : > { %s1654_s18 = sld [smem:[#allocation16_spill]] }
 0x3fc   : > { %p1002_p0 = scmp.ge.s32.totalorder %s1653_s29, 2 }
 0x3fd   : > { %s773_s25 = sand.u32 1, %s1654_s18  }
 0x3fe   : > { %p996_p1 = pnand %p1002_p0, %p1402_p7  ;;  %s774_s10 = scalar_lea.sflag [#allocation8], %s773_s25 }
 0x400   : > { %p997_p4 = pneg %p996_p1 }
 0x402   : > { %1208 = dma.done.wait (%p997_p4), %s774_s10, 128  }
 0x403   : > { %1210 = vsyncadd (%p997_p4), %s774_s10, 4294967168  ;;  %s1656_s17 = sld [smem:[#allocation13_spill]]  ;;  %p999_p2 = pnand %p1002_p0, %p1426_p13 }
 0x405   : > { %p1000_p5 = pneg %p999_p2 }
 0x409   : > { %s783_s20 = sand.u32 1, %s1656_s17  }
 0x40a   : > { %s784_s8 = scalar_lea.sflag [#allocation10], %s783_s20 }
 0x40b   : > { %1212 = dma.done.wait (%p1000_p5), %s784_s8, 64  }
 0x40c   : > { %1214 = vsyncadd (%p1000_p5), %s784_s8, 4294967232  ;;  %s26_s19 = sadd.s32 1, %s1653_s29   ;;  %s1658_s30 = sld [smem:[#allocation14_spill]] }
 0x40d   : > { %p23_p12 = scmp.ge.s32.totalorder %s26_s19, 10   ;;  %s1659_s10 = sld [smem:[#allocation15_spill]] }
 0x40e   : > { %s1660_s11 = sld [smem:[#allocation28_spill]] }
 0x40f   : > { %s1661_s12 = sld [smem:[#allocation17_spill]] }
 0x410   : > { %s1662_s13 = sld [smem:[#allocation18_spill]] }
 0x411   : > { %s1663_s14 = sld [smem:[#allocation27_spill]]  ;;  %25 = sbr.rel (!%p23_p12) target bundleno = 13 (0xd), region = 138 }
 0x412   : > { %s1664_s15 = sld [smem:[#allocation19_spill]] }
 0x413   : > { %s1665_s16 = sld [smem:[#allocation20_spill]] }
 0x414   : > { %s1666_s17 = sld [smem:[#allocation22_spill]] }
 0x415   : > { %s1667_s18 = sld [smem:[#allocation24_spill]] }
 0x416   :  { %790 = vsyncpa [#allocation8], 1 }
 0x417   :  { %792 = vsyncpa [#allocation8 + $0x1], 1 }
 0x418   :  { %793 = vsyncpa [#allocation10], 1 }
 0x419   :  { %795 = vsyncpa [#allocation10 + $0x1], 1 }

</bundles_post_ra>
